<compile_context>
chip_gen: v6e
topology: v6e:2x2x1
jax: 0.10.0
libtpu: 0.0.40
codegen_flags: <defaults>
</compile_context>

<pallas_src>
import math
import functools

import jax
import jax.numpy as jnp
from jax import lax
from jax.experimental import pallas as pl
from jax.experimental.pallas import tpu as pltpu


def _round_up(x: int, m: int) -> int:
    return ((x + m - 1) // m) * m


def _vmem_capacity_bytes() -> int:
    try:
        return int(pltpu.get_tpu_info().vmem_capacity_bytes)
    except Exception:
        return 64 << 20  # conservative fallback (v7x per-core VMEM)


# ---------------------------------------------------------------------------
# Path 1: small vocabulary -> one-hot matmul on the MXU.
# ---------------------------------------------------------------------------
def _embed_onehot_kernel(ids_ref, table_ref, out_ref, *, scale, chunk):
    # ids_ref   : (T, 1) int32 VMEM block
    # table_ref : (n_vocab, d_model) VMEM-resident (constant index_map)
    # out_ref   : (T, d_model) VMEM block
    T = out_ref.shape[0]
    n_vocab = table_ref.shape[0]
    tbl = table_ref[...]
    for start in range(0, T, chunk):                    # static Python loop
        cs = min(chunk, T - start)
        ids_c = ids_ref[pl.ds(start, cs), :]                        # (cs, 1)
        iota = lax.broadcasted_iota(jnp.int32, (cs, n_vocab), 1)
        onehot = (iota == ids_c).astype(tbl.dtype)                  # (cs, n_vocab)
        acc = jnp.dot(onehot, tbl, preferred_element_type=jnp.float32)
        out_ref[pl.ds(start, cs), :] = (acc * scale).astype(out_ref.dtype)


# ---------------------------------------------------------------------------
# Path 2: general vocabulary -> single-buffered VMEM-resident table + packed
# row gather (one full (row_group, d_model) store per group of tokens).
# ---------------------------------------------------------------------------
def _embed_gather_kernel(ids_ref, table_hbm_ref, out_ref, table_vmem, dma_sem,
                         *, scale, block_tokens, row_group):
    # ids_ref       : (T,) int32 SMEM block (pipelined per step)
    # table_hbm_ref : (n_vocab, d_model) in HBM (memory_space=pl.ANY)
    # out_ref       : (T, d_model) VMEM block
    # table_vmem    : (n_vocab, d_model) VMEM scratch (persists across steps)

    # One-time HBM -> VMEM copy of the full table (single resident copy).
    # The grid runs sequentially on one core ("arbitrary"), so step 0's load
    # is reused by every later step.
    @pl.when(pl.program_id(0) == 0)
    def _():
        cp = pltpu.make_async_copy(table_hbm_ref, table_vmem, dma_sem)
        cp.start()
        cp.wait()

    d_model = out_ref.shape[-1]
    sub = lax.broadcasted_iota(jnp.int32, (row_group, d_model), 0)

    def gather_group(g, carry):
        base = pl.multiple_of(g * row_group, row_group)
        tile = jnp.zeros((row_group, d_model), table_vmem.dtype)
        for j in range(row_group):                       # static unroll
            tok = ids_ref[base + j]                      # SMEM scalar load
            row = table_vmem[pl.ds(tok, 1), :]           # (1, d_model) dynamic row
            tile = jnp.where(sub == j, row, tile)        # pack into sublane j (VPU)
        # Full, unmasked (row_group, d_model) store; scale applied once per tile.
        out_ref[pl.ds(base, row_group), :] = (tile * scale).astype(out_ref.dtype)
        return carry

    lax.fori_loop(0, block_tokens // row_group, gather_group, 0, unroll=2)


# ---------------------------------------------------------------------------
# Wrapper
# ---------------------------------------------------------------------------
def embeddings_forward(x_ids: jax.Array, table: jax.Array, *,
                       block_tokens: int = 1024,
                       mxu_vocab_threshold: int = 512) -> jax.Array:
    """x_ids: (B, S) int token ids; table: (n_vocab, d_model) weights."""
    B, S = x_ids.shape
    n_vocab, d_model = table.shape
    scale = math.sqrt(float(d_model))
    itemsize = jnp.dtype(table.dtype).itemsize
    # Sublane group giving dense (8,128)-tiled output stores (8 f32 / 16 bf16 / ...).
    row_group = 8 * max(1, 4 // itemsize)

    n_tok = B * S
    table_bytes = n_vocab * d_model * itemsize
    use_mxu = n_vocab <= mxu_vocab_threshold

    budget = int(0.85 * _vmem_capacity_bytes())
    slack = 2 << 20
    # MXU path keeps the table as a (double-buffered) pipelined input; gather
    # path holds exactly one copy in VMEM scratch.
    table_resident = (2 if use_mxu else 1) * table_bytes

    def per_step_bytes(t):
        out_buf = 2 * t * d_model * itemsize             # double-buffered output
        if use_mxu:
            ids_buf = 2 * t * 128 * 4                     # (T,1) int32, lane-padded
            onehot = 2 * min(256, t) * _round_up(n_vocab, 128) * 4
            return out_buf + ids_buf + onehot
        return out_buf                                    # ids live in SMEM

    if table_resident + per_step_bytes(row_group) + slack > budget:
        # TODO(synk): HBM row-gather fallback for tables that do not fit VMEM.
        raise NotImplementedError(
            f"embedding table ({table_bytes / 2**20:.1f} MiB) does not fit the "
            f"VMEM budget ({budget / 2**20:.1f} MiB); HBM row-gather fallback "
            "is not implemented")

    # Token block: as large as requested, shrunk until it fits next to the
    # resident table (amortizes per-step grid overhead, lane/sublane-dense output).
    T = _round_up(min(block_tokens, _round_up(n_tok, row_group)), row_group)
    while T > row_group and table_resident + per_step_bytes(T) + slack > budget:
        T = _round_up(T // 2, row_group)

    n_pad = _round_up(n_tok, T)
    num_blocks = n_pad // T

    # nn.Embedding raises on out-of-range ids; clamp instead so there are no
    # OOB VMEM reads (valid ids are unaffected, padding tokens use id 0).
    flat_ids = jnp.clip(x_ids.reshape(-1).astype(jnp.int32), 0, n_vocab - 1)
    if n_pad != n_tok:
        flat_ids = jnp.pad(flat_ids, (0, n_pad - n_tok))

    needed = table_resident + per_step_bytes(T) + slack
    vmem_limit = int(min(max(needed, 32 << 20), budget))

    if use_mxu:
        kernel = functools.partial(_embed_onehot_kernel, scale=scale,
                                   chunk=min(256, T))
        ids_in = flat_ids.reshape(n_pad, 1)
        in_specs = [
            pl.BlockSpec((T, 1), lambda i: (i, 0)),                    # ids (VMEM)
            pl.BlockSpec((n_vocab, d_model), lambda i: (0, 0)),        # resident table
        ]
        scratch_shapes = []
        dim_sem = ("parallel",)
    else:
        kernel = functools.partial(_embed_gather_kernel, scale=scale,
                                   block_tokens=T, row_group=row_group)
        ids_in = flat_ids
        in_specs = [
            pl.BlockSpec((T,), lambda i: (i,),
                         memory_space=pltpu.MemorySpace.SMEM),         # ids (SMEM)
            pl.BlockSpec(memory_space=pl.ANY),                         # table in HBM
        ]
        scratch_shapes = [
            pltpu.VMEM((n_vocab, d_model), table.dtype),   # single resident copy
            pltpu.SemaphoreType.DMA(()),
        ]
        # One-time table load is gated on program_id==0 -> sequential grid.
        dim_sem = ("arbitrary",)

    out_flat = pl.pallas_call(
        kernel,
        out_shape=jax.ShapeDtypeStruct((n_pad, d_model), table.dtype),
        grid=(num_blocks,),
        in_specs=in_specs,
        out_specs=pl.BlockSpec((T, d_model), lambda i: (i, 0)),
        scratch_shapes=scratch_shapes,
        compiler_params=pltpu.CompilerParams(
            dimension_semantics=dim_sem,
            vmem_limit_bytes=vmem_limit,
        ),
    )(ids_in, table)

    return out_flat[:n_tok].reshape(B, S, d_model)


if __name__ == "__main__":
    d_model = 128
    B, S = 2, 8
    scale = math.sqrt(float(d_model))
    key = jax.random.PRNGKey(0)
    k_tab_s, k_tab_l, k_ids_s, k_ids_l = jax.random.split(key, 4)

    # ---- small vocab: MXU one-hot path ------------------------------------
    n_vocab_small = 64
    # bf16-exact table values so the check does not depend on the backend's
    # f32 matmul operand precision (a one-hot matmul of bf16-exact values is
    # exact either way).
    table_s = jax.random.normal(k_tab_s, (n_vocab_small, d_model),
                                dtype=jnp.float32)
    table_s = table_s.astype(jnp.bfloat16).astype(jnp.float32)
    ids_s = jax.random.randint(k_ids_s, (B, S), 0, n_vocab_small, dtype=jnp.int32)
    ref_s = jnp.take(table_s, ids_s, axis=0) * scale

    out = jax.block_until_ready(embeddings_forward(ids_s, table_s))
    assert out.shape == (B, S, d_model)
    assert out.dtype == jnp.float32
    assert bool(jnp.allclose(out, ref_s, atol=1e-5, rtol=1e-5))

    # multiple grid steps on the MXU path
    out2 = jax.block_until_ready(embeddings_forward(ids_s, table_s, block_tokens=8))
    assert bool(jnp.allclose(out2, ref_s, atol=1e-5, rtol=1e-5))

    # padding path (token count not a multiple of the sublane group)
    ids_odd = jax.random.randint(jax.random.PRNGKey(1), (2, 5), 0, n_vocab_small,
                                 dtype=jnp.int32)
    out3 = jax.block_until_ready(embeddings_forward(ids_odd, table_s))
    ref3 = jnp.take(table_s, ids_odd, axis=0) * scale
    assert bool(jnp.allclose(out3, ref3, atol=1e-5, rtol=1e-5))

    # ---- larger vocab: VMEM-resident gather path ---------------------------
    n_vocab_large = 4096
    table_l = jax.random.normal(k_tab_l, (n_vocab_large, d_model), dtype=jnp.float32)
    ids_l = jax.random.randint(k_ids_l, (B, S), 0, n_vocab_large, dtype=jnp.int32)
    ref_l = jnp.take(table_l, ids_l, axis=0) * scale

    out4 = jax.block_until_ready(embeddings_forward(ids_l, table_l))
    assert bool(jnp.allclose(out4, ref_l, atol=1e-6, rtol=1e-6))

    # multiple grid steps: table is DMA'd once at step 0 and reused at step 1
    out5 = jax.block_until_ready(embeddings_forward(ids_l, table_l, block_tokens=8))
    assert bool(jnp.allclose(out5, ref_l, atol=1e-6, rtol=1e-6))

    print("KERNEL_OK")
</pallas_src>

<mosaic_0001>
module attributes {stable_mosaic.version = 11 : i64} {
  func.func @_embed_onehot_kernel(%arg0: i32, %arg1: memref<16x1xi32, #tpu.memory_space<vmem>>, %arg2: memref<64x128xf32, #tpu.memory_space<vmem>>, %arg3: memref<16x128xf32, #tpu.memory_space<vmem>>) attributes {dimension_semantics = [#tpu.dimension_semantics<parallel>], iteration_bounds = array<i64: 1>, scalar_prefetch = 0 : i64, scratch_operands = 0 : i64, tpu.core_type = #tpu.core_type<tc>, window_params = [{transform_indices = @transform_0, window_bounds = array<i64: 16, 1>}, {pipeline_mode = #tpu.pipeline_mode<synchronous>, transform_indices = @transform_1, window_bounds = array<i64: 64, 128>}, {transform_indices = @transform_2, window_bounds = array<i64: 16, 128>}]} {
    %c0 = arith.constant 0 : index
    %c0_0 = arith.constant 0 : index
    %0 = vector.load %arg2[%c0, %c0_0] : memref<64x128xf32, #tpu.memory_space<vmem>>, vector<64x128xf32>
    %c0_1 = arith.constant 0 : index
    %c0_2 = arith.constant 0 : index
    %1 = vector.load %arg1[%c0_1, %c0_2] : memref<16x1xi32, #tpu.memory_space<vmem>>, vector<16x1xi32>
    %2 = tpu.iota {dimensions = array<i32: 1>} : vector<16x64xi32>
    %3 = vector.broadcast %1 : vector<16x1xi32> to vector<16x64xi32>
    %4 = arith.cmpi eq, %2, %3 : vector<16x64xi32>
    %5 = arith.extui %4 : vector<16x64xi1> to vector<16x64xi32>
    %6 = arith.sitofp %5 : vector<16x64xi32> to vector<16x64xf32>
    %cst = arith.constant dense<0.000000e+00> : vector<16x128xf32>
    %7 = tpu.matmul %6, %0, %cst {dimension_numbers = #tpu.dot_dimension_numbers<[1], [0], [0], [1], [0, 0, 1, 1], [], []>} : vector<16x64xf32>, vector<64x128xf32>, vector<16x128xf32> -> vector<16x128xf32>
    %cst_3 = arith.constant 11.3137083 : f32
    %8 = vector.broadcast %cst_3 : f32 to vector<16x128xf32>
    %9 = arith.mulf %7, %8 : vector<16x128xf32>
    %c0_4 = arith.constant 0 : index
    %c0_5 = arith.constant 0 : index
    %10 = vector.load %arg3[%c0_4, %c0_5] : memref<16x128xf32, #tpu.memory_space<vmem>>, vector<16x128xf32>
    tpu.vector_store %arg3[%c0_4, %c0_5], %9 {strides = array<i32>} : memref<16x128xf32, #tpu.memory_space<vmem>>, vector<16x128xf32>,
    return
  }
  func.func @transform_0(%arg0: i32) -> (i32, i32) {
    %c0_i32 = arith.constant 0 : i32
    %c0_i32_0 = arith.constant 0 : i32
    return %arg0, %c0_i32 : i32, i32
  }
  func.func @transform_1(%arg0: i32) -> (i32, i32) {
    %c0_i32 = arith.constant 0 : i32
    %c0_i32_0 = arith.constant 0 : i32
    %c0_i32_1 = arith.constant 0 : i32
    return %c0_i32, %c0_i32_0 : i32, i32
  }
  func.func @transform_2(%arg0: i32) -> (i32, i32) {
    %c0_i32 = arith.constant 0 : i32
    %c0_i32_0 = arith.constant 0 : i32
    return %arg0, %c0_i32 : i32, i32
  }
}

</mosaic_0001>

<bundles_post_ra>
// kernel: tpu_custom_call.1
= control target key start
LH: loop header
LB: loop body
LE: loop exit
PB: predicated region body
PF: predicated region fallthrough
CT: control target
= control target key end

     0   :  { %7 = vsyncpa [#allocation3], 0  ;;  %s276_s0 = inlined_call_operand.vmem [shape: s32[16,1], index: 0, kind: input, shape index: {}]   ;;  %s277_s1 = inlined_call_operand.hbm [shape: f32[64,128], index: 1, kind: input, shape index: {}]   ;;  %s278_s2 = inlined_call_operand.hbm [shape: f32[16,128], index: 2, kind: output, shape index: {}]  }
   0x1   :  { %8 = vsyncpa [#allocation4], 0  ;;  %s237_s9 = smov [#allocation2]  }
   0x2   :  { %s16_s10 = sshll.u32 %s237_s9, 4  ;;  %s17_s10 = int_to_ptr.vmem [resolvable:$true] %s16_s10 }
   0x3   :  { %s201_s11 = scalar_lea.vmem %s17_s10, 1024  ;;  %p206_p1 = scmp.lt.s32.totalorder %s17_s10, %s17_s10 }
   0x4   :  { %p202_p0 = scmp.ne.s32.totalorder %s17_s10, %s201_s11  ;;  %p207_p2 = scmp.lt.s32.totalorder %s201_s11, %s201_s11 }
   0x6   :  { %p208_p3 = por %p207_p2, %p206_p1 }
   0x8   :  { %p209_p4 = pnand %p208_p3, %p202_p0 }
   0xa   :  { %212 = shalt.err (!%p209_p4)
}
   0xb   :  { %s238_s12 = smov 128   ;;  %s239_s13 = smov 8  }
   0xc   :  { %22 = dma.hbm_to_vmem [thread:$0]  %s277_s1, 1024, %s17_s10, [#allocation3], %s238_s12, %s238_s12, %s239_s13  }
   0xd   :  { %233 = dma.done.wait [#allocation3], 1024  }
   0xe   :  { %234 = vsyncadd [#allocation3], 4294966272  ;;  %v240_v0 = vmov 0   ;;  %v34_v1 = vld [vmem:[%s276_s0] sm:$0xff]  ;;  %v33_v2 = vld [vmem:[#allocation2 + $0x38] sm:$0xff]  ;;  %v36_v11 = vlaneseq  ;;  %vm50_vm0 = vcmask 523264  }
   0xf   :  { %192 = vset.pattern.permute.xlu0 %v240_v0  ;;  %167 = vmatprep.subr.mxu0 %v33_v2  ;;  %v32_v3 = vld [vmem:[#allocation2 + $0x30] sm:$0xff]  ;;  %v35_v4 = vld [vmem:[%s276_s0 + $0x8] sm:$0xff]  ;;  %v30_v6 = vld [vmem:[#allocation2 + $0x20] sm:$0xff]  ;;  %v241_v14 = vmov 0.0   ;;  %s242_s0 = smov [#allocation5]  }
  0x10   :  { %39 = vperm.xlu0 %192, %v34_v1   ;;  %168 = vmatpush3.msra.mxu0 %v33_v2  ;;  %v31_v5 = vld [vmem:[#allocation2 + $0x28] sm:$0xff]  ;;  %v29_v7 = vld [vmem:[#allocation2 + $0x18] sm:$0xff]  ;;  %v28_v8 = vld [vmem:[#allocation2 + $0x10] sm:$0xff]  ;;  %v37_v12 = vand.u32 127, %v36_v11  ;;  %s141_s1 = sshll.u32 %s242_s0, 4  ;;  %s142_s1 = int_to_ptr.vmem [resolvable:$true] %s141_s1 }
  0x11   :  { %169 = vmatprep.subr.mxu0 %v32_v3  ;;  %v27_v9 = vld [vmem:[#allocation2 + $0x8] sm:$0xff]  ;;  %v26_v10 = vld [vmem:[#allocation2] sm:$0xff]  ;;  %s213_s20 = scalar_lea.vmem %s142_s1, 256  ;;  %p218_p6 = scmp.lt.s32.totalorder %s142_s1, %s142_s1 }
  0x12   :  { %170 = vmatpush3.msra.mxu0 %v32_v3  ;;  %p214_p5 = scmp.ne.s32.totalorder %s142_s1, %s213_s20  ;;  %p219_p7 = scmp.lt.s32.totalorder %s213_s20, %s213_s20 }
  0x13   :  { %171 = vmatprep.subr.mxu0 %v31_v5 }
  0x14   :  { %42 = vperm.xlu0 %192, %v35_v4   ;;  %172 = vmatpush3.msra.mxu0 %v31_v5  ;;  %p220_p8 = por %p219_p7, %p218_p6 }
  0x15   :  { %173 = vmatprep.subr.mxu0 %v30_v6 }
  0x16   :  { %174 = vmatpush3.msra.mxu0 %v30_v6  ;;  %p221_p9 = pnand %p220_p8, %p214_p5 }
  0x17   :  { %175 = vmatprep.subr.mxu0 %v29_v7 }
  0x18   :  { %176 = vmatpush3.msra.mxu0 %v29_v7 }
  0x19   :  { %177 = vmatprep.subr.mxu0 %v28_v8 }
  0x1a   :  { %178 = vmatpush3.msra.mxu0 %v28_v8 }
  0x1b   :  { %179 = vmatprep.subr.mxu0 %v27_v9 }
  0x1c   :  { %180 = vmatpush3.msra.mxu0 %v27_v9 }
  0x1d   :  { %181 = vmatprep.subr.mxu0 %v26_v10 }
  0x1e   :  { %182 = vmatpush3.msra.mxu0 %v26_v10 }
  0x8b   :  { %v40_v13 = vpop.permute.xlu0 %39 }
  0x8c   :  { %vm44_vm1 = vcmp.eq.s32.totalorder %v37_v12, %v40_v13 }
  0x8d   :  { %v153_v15 = vsel %vm44_vm1, 1.0, %v241_v14 }
  0x8e   :  { %183 = vmatprep.mubr.msk.f32.mxu0 %vm50_vm0, %v153_v15 }
  0x8f   :  { %v43_v16 = vpop.permute.xlu0 %42 }
  0x90   :  { %vm45_vm2 = vcmp.eq.s32.totalorder %v37_v12, %v43_v16 }
  0x91   :  { %v154_v17 = vsel %vm45_vm2, 1.0, %v241_v14 }
  0x92   :  { %184 = vmatmul.mubr.msk.f32.vlgmr.msra.gmra.mxu0 %vm50_vm0, %v154_v17 }
 0x152   :  { %v185_v18 = vpop.f32.mrf.mxu0 }
 0x153   :  { %v133_v19 = vmul.f32 11.313708, %v185_v18 }
 0x154   :  { %v123_v20 = vpop.f32.mrf.mxu0 }
 0x155   :  { %135 = vst [vmem:[#allocation5 + $0x8] sm:$0xff] %v133_v19  ;;  %v132_v21 = vmul.f32 11.313708, %v123_v20 }
 0x157   :  { %134 = vst [vmem:[#allocation5] sm:$0xff] %v132_v21 }
 0x158   :  { %224 = shalt.err (!%p221_p9)
}
 0x159   :  { %147 = dma.vmem_to_hbm [thread:$0]  %s142_s1, 256, %s278_s2, [#allocation4], %s238_s12, %s238_s12, %s239_s13  }
 0x15a   :  { %235 = dma.done.wait [#allocation4], 256  }
 0x15b   :  { %236 = vsyncadd [#allocation4], 4294967040 }
 0x15c   :  { %151 = vsyncpa [#allocation3], 1 }
 0x15d   :  { %152 = vsyncpa [#allocation4], 1 }

</bundles_post_ra>
